<compile_context>
chip_gen: v7x
topology: tpu7x:2x2x1
jax: 0.10.0
libtpu: 0.0.40
codegen_flags: <defaults>
</compile_context>

<pallas_src>
import math

import jax
import jax.numpy as jnp
from jax.experimental import pallas as pl
from jax.experimental.pallas import tpu as pltpu


_INV_SQRT2 = 1.0 / math.sqrt(2.0)


def _gelu_kernel(x_ref, o_ref):
    # Exact GELU: x * 0.5 * (1 + erf(x / sqrt(2)))  (torch.nn.functional.gelu default).
    x = x_ref[...].astype(jnp.float32)
    y = x * 0.5 * (1.0 + jax.lax.erf(x * _INV_SQRT2))
    o_ref[...] = y.astype(o_ref.dtype)


def _round_up(v, m):
    return ((v + m - 1) // m) * m


def _sublane_pack(dtype):
    # Sub-32-bit dtypes pack along sublanes: f32 -> 8, bf16 -> 16, int8/fp8 -> 32.
    itemsize = jnp.dtype(dtype).itemsize
    return max(8, (32 // max(1, itemsize * 8)) * 8)


def _as_2d(x):
    """Pick a lane-dense 2-D view of x (reshapes of default-layout arrays are free)."""
    n = math.prod(x.shape) if x.ndim else 1
    pack = _sublane_pack(x.dtype)
    if n >= 128 and n % 128 == 0:
        # Lane-dense repack: columns a multiple of 128; prefer wider columns while
        # keeping enough rows for sublane packing.
        cols = 128
        for c in (1024, 512, 256):
            if n % c == 0 and (n // c) >= pack:
                cols = c
                break
        return x.reshape(n // cols, cols)
    if x.ndim >= 2:
        # Merge trailing dims until the lane width reaches >= 128.
        cols = 1
        split = x.ndim
        while split > 1 and cols < 128:
            split -= 1
            cols *= x.shape[split]
        return x.reshape(n // cols, cols)
    # 0-D / small 1-D fallback.
    return x.reshape(1, max(n, 1))


def _choose_blocks(rows, cols, dtype, target_tile_bytes):
    itemsize = jnp.dtype(dtype).itemsize
    pack = _sublane_pack(dtype)
    max_tile_elems = max(pack * 128, target_tile_bytes // itemsize)

    # Column block: full width when it fits the budget at `pack` rows, otherwise a
    # multiple of 128 (the ragged final column block is masked by Pallas).
    if cols * pack <= max_tile_elems:
        col_block = cols
    else:
        col_block = max(128, ((max_tile_elems // pack) // 128) * 128)
        col_block = min(col_block, cols)

    # Row block: VMEM budget, rounded to the sublane packing; keep the grid at
    # least ~8 steps wide where the tensor allows (feeds both v7x TCs / megacore).
    if rows <= pack:
        row_block = rows
    else:
        br_budget = max(pack, ((max_tile_elems // col_block) // pack) * pack)
        br_parallel = max(pack, _round_up(pl.cdiv(rows, 8), pack))
        row_block = min(br_budget, br_parallel, _round_up(rows, pack))
    return row_block, col_block


def gelu_pallas(x, *, target_tile_bytes=2 * 1024 * 1024):
    orig_shape = x.shape
    n = math.prod(orig_shape) if x.ndim else 1
    if n == 0:
        return x

    x2d = _as_2d(x)
    rows, cols = x2d.shape
    row_block, col_block = _choose_blocks(rows, cols, x2d.dtype, target_tile_bytes)
    grid = (pl.cdiv(rows, row_block), pl.cdiv(cols, col_block))

    out = pl.pallas_call(
        _gelu_kernel,
        out_shape=jax.ShapeDtypeStruct((rows, cols), x2d.dtype),
        grid=grid,
        in_specs=[pl.BlockSpec((row_block, col_block), lambda i, j: (i, j))],
        out_specs=pl.BlockSpec((row_block, col_block), lambda i, j: (i, j)),
        compiler_params=pltpu.CompilerParams(
            dimension_semantics=("parallel", "parallel"),
            # Covers 2x(in+out) double-buffered ~2 MiB tiles plus f32 temporaries
            # on every generation (v5e's scoped default is only 16 MiB).
            vmem_limit_bytes=32 * 1024 * 1024,
        ),
    )(x2d)
    return out.reshape(orig_shape)


def _gelu_ref(x):
    xf = x.astype(jnp.float32)
    return (xf * 0.5 * (1.0 + jax.lax.erf(xf * _INV_SQRT2))).astype(x.dtype)


if __name__ == "__main__":
    key = jax.random.PRNGKey(0)
    k1, k2, k3, k4 = jax.random.split(key, 4)

    # Transformer-ish activation (numel % 128 == 0 -> lane-dense repack path).
    x1 = jax.random.normal(k1, (8, 32), dtype=jnp.float32)
    # Ragged multi-dim (numel % 128 != 0 -> trailing-dim merge fallback path).
    x2 = jax.random.normal(k2, (3, 20, 48), dtype=jnp.float32)
    # 4-D bf16 input (repack path, sublane packing of 16).
    x3 = jax.random.normal(k3, (2, 4, 16, 16), dtype=jnp.bfloat16)
    # Small 1-D input (routed through the (1, N) fallback).
    x4 = jax.random.normal(k4, (127,), dtype=jnp.float32)

    for xt in (x1, x2, x3, x4):
        y = gelu_pallas(xt)
        jax.block_until_ready(y)
        ref = _gelu_ref(xt)
        assert y.shape == xt.shape and y.dtype == xt.dtype
        is_bf16 = xt.dtype == jnp.bfloat16
        assert jnp.allclose(
            y.astype(jnp.float32), ref.astype(jnp.float32),
            atol=2e-2 if is_bf16 else 1e-5, rtol=1e-2 if is_bf16 else 1e-5,
        )

    print("KERNEL_OK")
</pallas_src>

<mosaic_0001>
module attributes {stable_mosaic.version = 11 : i64} {
  func.func @_gelu_kernel(%arg0: i32, %arg1: i32, %arg2: memref<2x128xf32, #tpu.memory_space<vmem>>, %arg3: memref<2x128xf32, #tpu.memory_space<vmem>>) attributes {dimension_semantics = [#tpu.dimension_semantics<parallel>, #tpu.dimension_semantics<parallel>], iteration_bounds = array<i64: 1, 1>, scalar_prefetch = 0 : i64, scratch_operands = 0 : i64, tpu.core_type = #tpu.core_type<tc>, window_params = [{transform_indices = @transform_0, window_bounds = array<i64: 2, 128>}, {transform_indices = @transform_1, window_bounds = array<i64: 2, 128>}]} {
    %c0 = arith.constant 0 : index
    %c0_0 = arith.constant 0 : index
    %0 = vector.load %arg2[%c0, %c0_0] : memref<2x128xf32, #tpu.memory_space<vmem>>, vector<2x128xf32>
    %cst = arith.constant 5.000000e-01 : f32
    %1 = vector.broadcast %cst : f32 to vector<2x128xf32>
    %2 = arith.mulf %0, %1 : vector<2x128xf32>
    %cst_1 = arith.constant 0.707106769 : f32
    %3 = vector.broadcast %cst_1 : f32 to vector<2x128xf32>
    %4 = arith.mulf %0, %3 : vector<2x128xf32>
    %5 = math.erf %4 : vector<2x128xf32>
    %cst_2 = arith.constant 1.000000e+00 : f32
    %6 = vector.broadcast %cst_2 : f32 to vector<2x128xf32>
    %7 = arith.addf %6, %5 : vector<2x128xf32>
    %8 = arith.mulf %2, %7 : vector<2x128xf32>
    %c0_3 = arith.constant 0 : index
    %c0_4 = arith.constant 0 : index
    %9 = vector.load %arg3[%c0_3, %c0_4] : memref<2x128xf32, #tpu.memory_space<vmem>>, vector<2x128xf32>
    tpu.vector_store %arg3[%c0_3, %c0_4], %8 {strides = array<i32>} : memref<2x128xf32, #tpu.memory_space<vmem>>, vector<2x128xf32>,
    return
  }
  func.func @transform_0(%arg0: i32, %arg1: i32) -> (i32, i32) {
    %c0_i32 = arith.constant 0 : i32
    return %arg0, %arg1 : i32, i32
  }
  func.func @transform_1(%arg0: i32, %arg1: i32) -> (i32, i32) {
    %c0_i32 = arith.constant 0 : i32
    return %arg0, %arg1 : i32, i32
  }
}

</mosaic_0001>

<bundles_post_ra>
// kernel: tpu_custom_call.1
= control target key start
LH: loop header
LB: loop body
LE: loop exit
PB: predicated region body
PF: predicated region fallthrough
CT: control target
= control target key end

     0   :  { %6 = vsyncpa [#allocation3], 0  ;;  %s131_s0 = inlined_call_operand.hbm [shape: f32[2,128], index: 0, kind: input, shape index: {}]   ;;  %s132_s1 = inlined_call_operand.hbm [shape: f32[2,128], index: 1, kind: output, shape index: {}]  }
   0x1   :  { %7 = vsyncpa [#allocation4], 0  ;;  %s95_s6 = smov [#allocation2]   ;;  %s47_s10 = scalar_lea.hbm %s131_s0, 32 }
   0x2   :  { %s14_s7 = sshll.u32 %s95_s6, 4  ;;  %p48_p0 = scmp.ne.s32.totalorder %s131_s0, %s47_s10  ;;  %s15_s7 = int_to_ptr.vmem [resolvable:$true] %s14_s7 }
   0x3   :  { %p51_p1 = scmp.lt.u32.totalorder %s47_s10, %s131_s0 }
   0x5   :  { %p53_p2 = pnand %p51_p1, %p48_p0 }
   0x7   :  { %56 = shalt.err (!%p53_p2)
}
   0x8   :  { %s57_s15 = scalar_lea.vmem %s15_s7, 32  ;;  %p62_p4 = scmp.lt.s32.totalorder %s15_s7, %s15_s7 }
   0x9   :  { %p58_p3 = scmp.ne.s32.totalorder %s15_s7, %s57_s15  ;;  %p63_p5 = scmp.lt.s32.totalorder %s57_s15, %s57_s15 }
   0xb   :  { %p64_p6 = por %p63_p5, %p62_p4 }
   0xd   :  { %p65_p7 = pnand %p64_p6, %p58_p3 }
   0xf   :  { %68 = shalt.err (!%p65_p7)
}
  0x10   :  { %17 = dma.hbm_to_vmem [thread:$0]  %s131_s0, 32, %s15_s7, [#allocation3]  }
  0x11   :  { %91 = dma.done.wait [#allocation3], 32  }
  0x12   :  { %92 = vsyncadd [#allocation3], 4294967264  ;;  %v21_v0 = vld [vmem:[#allocation2] sm:$0x3]  ;;  %s96_s18 = smov [#allocation5]  }
  0x13   :  { %v23_v1 = vmul.f32 0.70710677, %v21_v0  ;;  %v22_v2 = vmul.f32 0.5, %v21_v0  ;;  %s34_s19 = sshll.u32 %s96_s18, 4  ;;  %s35_s19 = int_to_ptr.vmem [resolvable:$true] %s34_s19 }
  0x14   :  { %s69_s20 = scalar_lea.vmem %s35_s19, 32  ;;  %p74_p9 = scmp.lt.s32.totalorder %s35_s19, %s35_s19 }
  0x15   :  { %45 = verf.f32 %v23_v1  ;;  %p70_p8 = scmp.ne.s32.totalorder %s35_s19, %s69_s20  ;;  %p75_p10 = scmp.lt.s32.totalorder %s69_s20, %s69_s20 }
  0x17   :  { %p76_p11 = por %p75_p10, %p74_p9 }
  0x19   :  { %p77_p12 = pnand %p76_p11, %p70_p8 }
  0x1f   :  { %v46_v3 = vpop.eup %45 }
  0x20   :  { %v25_v4 = vadd.f32 1.0, %v46_v3 }
  0x22   :  { %v26_v5 = vmul.f32 %v25_v4, %v22_v2 }
  0x24   :  { %27 = vst [vmem:[#allocation5] sm:$0x3] %v26_v5 }
  0x25   :  { %80 = shalt.err (!%p77_p12)
}
  0x26   :  { %s81_s22 = scalar_lea.hbm %s132_s1, 32 }
  0x27   :  { %p82_p13 = scmp.ne.s32.totalorder %s132_s1, %s81_s22  ;;  %p85_p0 = scmp.lt.u32.totalorder %s81_s22, %s132_s1 }
  0x29   :  { %p87_p1 = pnand %p85_p0, %p82_p13 }
  0x2b   :  { %90 = shalt.err (!%p87_p1)
}
  0x2c   :  { %37 = dma.vmem_to_hbm [thread:$0]  %s35_s19, 32, %s132_s1, [#allocation4]  }
  0x2d   :  { %93 = dma.done.wait [#allocation4], 32  }
  0x2e   :  { %94 = vsyncadd [#allocation4], 4294967264 }
  0x2f   :  { %41 = vsyncpa [#allocation3], 1 }
  0x30   :  { %42 = vsyncpa [#allocation4], 1 }

</bundles_post_ra>
